<compile_context>
chip_gen: v5e
topology: v5e:2x2
jax: 0.10.0
libtpu: 0.0.40
codegen_flags: <defaults>
</compile_context>

<pallas_src>
import jax
import jax.numpy as jnp
from jax.experimental import pallas as pl
from jax.experimental.pallas import tpu as pltpu


# ----------------------------- Pallas kernel ---------------------------------

def _dropout_kernel(seed_ref, thr_ref, scale_ref, x_ref, o_ref):
    # One grid step processes one (tile_r, W) lane-dense tile.
    tile_r, w = x_ref.shape
    row0 = pl.program_id(0) * tile_r

    # Global element index of every element in this tile (2-D iota only).
    rows = jax.lax.broadcasted_iota(jnp.int32, (tile_r, w), 0) + row0
    cols = jax.lax.broadcasted_iota(jnp.int32, (tile_r, w), 1)
    idx = (rows * w + cols).astype(jnp.uint32)

    # Counter-based PRNG: lowbias32 finalizer over (index + seed * golden).
    # Pure VPU bit ops; mask is independent of the tiling.
    h = idx + seed_ref[0].astype(jnp.uint32) * jnp.uint32(0x9E3779B9)
    h = h ^ (h >> 16)
    h = h * jnp.uint32(0x7FEB352D)
    h = h ^ (h >> 15)
    h = h * jnp.uint32(0x846CA68B)
    h = h ^ (h >> 16)

    # keep  <=>  uniform > rate  <=>  top-24 random bits > floor(rate * 2^24)
    keep = (h >> 8) > thr_ref[0].astype(jnp.uint32)

    x = x_ref[...]
    scale = scale_ref[0].astype(x.dtype)          # one scalar, native dtype
    o_ref[...] = jnp.where(keep, x * scale, jnp.zeros_like(x))


# ------------------------------- wrapper --------------------------------------

def _choose_slab(n, itemsize):
    """Pick (W, rows, tile_r, n_padded) for a lane-dense (rows, W) slab of n elems."""
    tile_budget_bytes = 4 * 1024 * 1024          # per-tile cap, safe on v7x VMEM

    # Prefer the widest multiple-of-128 lane dim that tiles n exactly.
    w = None
    for cand in (2048, 1024, 512, 256, 128):
        if n % cand == 0 and (n // cand) % 8 == 0:
            w = cand
            break
    if w is not None:
        r, n_pad = n // w, n
    else:
        # Ragged size: pad the flattened array up to a full (mult-of-8, W) slab.
        w = 512 if n >= 8 * 512 else 128
        r = -(-n // w)
        r = ((r + 7) // 8) * 8
        n_pad = r * w

    # Largest multiple-of-8 divisor of r under the budget, preferring >= 2 grid
    # steps so the "parallel" axis can shard across v7x's two TensorCores.
    cap_rows = max(8, (tile_budget_bytes // (itemsize * w)) // 8 * 8)
    m = r // 8
    divs, i = set(), 1
    while i * i <= m:
        if m % i == 0:
            divs.add(i)
            divs.add(m // i)
        i += 1
    cands = [8 * d for d in divs if 8 * d <= cap_rows]
    pref = [c for c in cands if r // c >= 2]
    tile_r = max(pref) if pref else (max(cands) if cands else 8)
    return w, r, tile_r, n_pad


def learnable_dropout(x, dropout_rate, *, seed=0, training=True):
    """Forward of LearnableDropout. Identity in eval mode, stochastic in training."""
    if not training:
        return x

    n = x.size
    itemsize = x.dtype.itemsize
    w, r, tile_r, n_pad = _choose_slab(n, itemsize)

    flat = x.reshape(-1)
    if n_pad != n:
        flat = jnp.pad(flat, (0, n_pad - n))
    x2 = flat.reshape(r, w)                       # lane-dense 2-D slab

    # Scalars (SMEM): clamp exactly like the PyTorch forward, then precompute
    # the u32 threshold and the single 1/(1-rate) scale.
    rate = jnp.clip(jnp.asarray(dropout_rate, jnp.float32), 0.0, 0.999)
    thr = (rate * jnp.float32(1 << 24)).astype(jnp.int32).reshape((1,))
    scale = (1.0 / (1.0 - rate)).astype(jnp.float32).reshape((1,))
    seed_arr = jnp.asarray([seed], dtype=jnp.int32)

    tile_bytes = tile_r * w * itemsize
    # Keep well under v7x's 64 MiB physical VMEM; plenty for double-buffering.
    vmem_limit = int(min(48 * 1024 * 1024, max(8 * 1024 * 1024, 6 * tile_bytes)))

    out2 = pl.pallas_call(
        _dropout_kernel,
        out_shape=jax.ShapeDtypeStruct((r, w), x.dtype),
        grid_spec=pltpu.PrefetchScalarGridSpec(
            num_scalar_prefetch=0,
            grid=(r // tile_r,),
            in_specs=[
                pl.BlockSpec(memory_space=pltpu.MemorySpace.SMEM),   # seed
                pl.BlockSpec(memory_space=pltpu.MemorySpace.SMEM),   # threshold
                pl.BlockSpec(memory_space=pltpu.MemorySpace.SMEM),   # scale
                pl.BlockSpec((tile_r, w), lambda i: (i, 0)),          # x tile
            ],
            out_specs=pl.BlockSpec((tile_r, w), lambda i: (i, 0)),
        ),
        compiler_params=pltpu.CompilerParams(
            dimension_semantics=("parallel",),
            vmem_limit_bytes=vmem_limit,
        ),
        cost_estimate=pl.CostEstimate(
            flops=4 * n_pad,
            transcendentals=0,
            bytes_accessed=2 * n_pad * itemsize,
        ),
    )(seed_arr, thr, scale, x2)

    out_flat = out2.reshape(-1)
    if n_pad != n:
        out_flat = out_flat[:n]
    return out_flat.reshape(x.shape)


# --------------------------------- main ----------------------------------------

if __name__ == "__main__":
    # Small, lane-dense shapes (batch=2, seq=8, hidden=128).
    B, T, D = 2, 8, 128

    key = jax.random.PRNGKey(0)
    x = jax.random.normal(key, (B, T, D), dtype=jnp.float32)

    dropout_rate = jnp.float32(0.1)   # current value of the learnable parameter
    seed = 1234

    # Training-mode forward through the Pallas kernel.
    out = jax.block_until_ready(
        learnable_dropout(x, dropout_rate, seed=seed, training=True))
    assert out.shape == x.shape and out.dtype == x.dtype

    # Eval-mode forward is the identity, like the PyTorch module.
    out_eval = learnable_dropout(x, dropout_rate, seed=seed, training=False)
    assert jnp.array_equal(out_eval, x)

    # Invariant 1: every surviving element equals x / (1 - rate).
    rate_c = float(jnp.clip(dropout_rate, 0.0, 0.999))
    scale = 1.0 / (1.0 - rate_c)
    dropped = (out == 0.0)
    kept_err = jnp.where(dropped, 0.0, jnp.abs(out - x * scale))
    assert float(jnp.max(kept_err)) < 1e-4, (
        f"max kept-value error = {float(jnp.max(kept_err))}")

    # Invariant 2: dropped fraction ~ rate (2048 elements -> sigma ~ 0.0066).
    frac = float(jnp.mean(dropped.astype(jnp.float32)))
    assert abs(frac - rate_c) < 0.05, f"drop fraction {frac} vs rate {rate_c}"

    # Invariant 3: deterministic for a fixed seed.
    out2 = jax.block_until_ready(
        learnable_dropout(x, dropout_rate, seed=seed, training=True))
    assert jnp.array_equal(out, out2)

    # Ragged-shape path (padding + lane-dense slab): shape + kept-value check.
    xr = jax.random.normal(jax.random.PRNGKey(1), (3, 5, 7), dtype=jnp.float32)
    outr = jax.block_until_ready(
        learnable_dropout(xr, dropout_rate, seed=seed, training=True))
    assert outr.shape == xr.shape
    kept_err_r = jnp.where(outr == 0.0, 0.0, jnp.abs(outr - xr * scale))
    assert float(jnp.max(kept_err_r)) < 1e-4

    print("KERNEL_OK")
</pallas_src>

<mosaic_0001>
module attributes {stable_mosaic.version = 11 : i64} {
  func.func @_dropout_kernel(%arg0: i32, %arg1: memref<1xi32, #tpu.memory_space<smem>>, %arg2: memref<1xi32, #tpu.memory_space<smem>>, %arg3: memref<1xf32, #tpu.memory_space<smem>>, %arg4: memref<8x256xf32, #tpu.memory_space<vmem>>, %arg5: memref<8x256xf32, #tpu.memory_space<vmem>>) attributes {dimension_semantics = [#tpu.dimension_semantics<parallel>], iteration_bounds = array<i64: 1>, scalar_prefetch = 0 : i64, scratch_operands = 0 : i64, tpu.core_type = #tpu.core_type<tc>, window_params = [{transform_indices = @transform_0, window_bounds = array<i64: 1>}, {transform_indices = @transform_1, window_bounds = array<i64: 1>}, {transform_indices = @transform_2, window_bounds = array<i64: 1>}, {transform_indices = @transform_3, window_bounds = array<i64: 8, 256>}, {transform_indices = @transform_4, window_bounds = array<i64: 8, 256>}]} {
    %c8_i32 = arith.constant 8 : i32
    %0 = arith.muli %arg0, %c8_i32 : i32
    %1 = tpu.iota {dimensions = array<i32: 0>} : vector<8x256xi32>
    %2 = vector.broadcast %0 : i32 to vector<8x256xi32>
    %3 = arith.addi %1, %2 : vector<8x256xi32>
    %4 = tpu.iota {dimensions = array<i32: 1>} : vector<8x256xi32>
    %c256_i32 = arith.constant 256 : i32
    %5 = vector.broadcast %c256_i32 : i32 to vector<8x256xi32>
    %6 = arith.muli %3, %5 : vector<8x256xi32>
    %7 = arith.addi %6, %4 : vector<8x256xi32>
    %c0 = arith.constant 0 : index
    %8 = memref.load %arg1[%c0] : memref<1xi32, #tpu.memory_space<smem>>
    %c-1640531527_i32 = arith.constant -1640531527 : i32
    %9 = arith.muli %8, %c-1640531527_i32 : i32
    %10 = vector.broadcast %9 : i32 to vector<8x256xi32>
    %11 = arith.addi %7, %10 : vector<8x256xi32>
    %c16_i32 = arith.constant 16 : i32
    %12 = vector.broadcast %c16_i32 : i32 to vector<8x256xi32>
    %13 = arith.shrui %11, %12 : vector<8x256xi32>
    %14 = arith.xori %11, %13 : vector<8x256xi32>
    %c2146121005_i32 = arith.constant 2146121005 : i32
    %15 = vector.broadcast %c2146121005_i32 : i32 to vector<8x256xi32>
    %16 = arith.muli %14, %15 : vector<8x256xi32>
    %c15_i32 = arith.constant 15 : i32
    %17 = vector.broadcast %c15_i32 : i32 to vector<8x256xi32>
    %18 = arith.shrui %16, %17 : vector<8x256xi32>
    %19 = arith.xori %16, %18 : vector<8x256xi32>
    %c-2073254261_i32 = arith.constant -2073254261 : i32
    %20 = vector.broadcast %c-2073254261_i32 : i32 to vector<8x256xi32>
    %21 = arith.muli %19, %20 : vector<8x256xi32>
    %c16_i32_0 = arith.constant 16 : i32
    %22 = vector.broadcast %c16_i32_0 : i32 to vector<8x256xi32>
    %23 = arith.shrui %21, %22 : vector<8x256xi32>
    %24 = arith.xori %21, %23 : vector<8x256xi32>
    %c8_i32_1 = arith.constant 8 : i32
    %25 = vector.broadcast %c8_i32_1 : i32 to vector<8x256xi32>
    %26 = arith.shrui %24, %25 : vector<8x256xi32>
    %c0_2 = arith.constant 0 : index
    %27 = memref.load %arg2[%c0_2] : memref<1xi32, #tpu.memory_space<smem>>
    %28 = vector.broadcast %27 : i32 to vector<8x256xi32>
    %29 = arith.cmpi ugt, %26, %28 : vector<8x256xi32>
    %c0_3 = arith.constant 0 : index
    %c0_4 = arith.constant 0 : index
    %30 = vector.load %arg4[%c0_3, %c0_4] : memref<8x256xf32, #tpu.memory_space<vmem>>, vector<8x256xf32>
    %c0_5 = arith.constant 0 : index
    %31 = memref.load %arg3[%c0_5] : memref<1xf32, #tpu.memory_space<smem>>
    %32 = vector.broadcast %31 : f32 to vector<8x256xf32>
    %33 = arith.mulf %30, %32 : vector<8x256xf32>
    %cst = arith.constant 0.000000e+00 : f32
    %34 = vector.broadcast %cst : f32 to vector<8x256xf32>
    %35 = arith.select %29, %33, %34 : vector<8x256xi1>, vector<8x256xf32>
    %c0_6 = arith.constant 0 : index
    %c0_7 = arith.constant 0 : index
    %36 = vector.load %arg5[%c0_6, %c0_7] : memref<8x256xf32, #tpu.memory_space<vmem>>, vector<8x256xf32>
    tpu.vector_store %arg5[%c0_6, %c0_7], %35 {strides = array<i32>} : memref<8x256xf32, #tpu.memory_space<vmem>>, vector<8x256xf32>,
    return
  }
  func.func @transform_0(%arg0: i32) -> i32 {
    %c0_i32 = arith.constant 0 : i32
    %c0_i32_0 = arith.constant 0 : i32
    return %c0_i32 : i32
  }
  func.func @transform_1(%arg0: i32) -> i32 {
    %c0_i32 = arith.constant 0 : i32
    %c0_i32_0 = arith.constant 0 : i32
    return %c0_i32 : i32
  }
  func.func @transform_2(%arg0: i32) -> i32 {
    %c0_i32 = arith.constant 0 : i32
    %c0_i32_0 = arith.constant 0 : i32
    return %c0_i32 : i32
  }
  func.func @transform_3(%arg0: i32) -> (i32, i32) {
    %c0_i32 = arith.constant 0 : i32
    %c0_i32_0 = arith.constant 0 : i32
    return %arg0, %c0_i32 : i32, i32
  }
  func.func @transform_4(%arg0: i32) -> (i32, i32) {
    %c0_i32 = arith.constant 0 : i32
    %c0_i32_0 = arith.constant 0 : i32
    return %arg0, %c0_i32 : i32, i32
  }
}

</mosaic_0001>

<bundles_post_ra>
// kernel: tpu_custom_call.1
= control target key start
LH: loop header
LB: loop body
LE: loop exit
PB: predicated region body
PF: predicated region fallthrough
CT: control target
= control target key end

     0   :  { %12 = vsyncpa [#allocation6], 0  ;;  %s204_s0 = inlined_call_operand.<no memory space> [shape: s32[1], index: 0, kind: input, shape index: {}]   ;;  %s205_s1 = inlined_call_operand.<no memory space> [shape: s32[1], index: 1, kind: input, shape index: {}]   ;;  %s206_s2 = inlined_call_operand.<no memory space> [shape: f32[1], index: 2, kind: input, shape index: {}]   ;;  %s207_s3 = inlined_call_operand.hbm [shape: f32[8,256], index: 3, kind: input, shape index: {}]   ;;  %s208_s4 = inlined_call_operand.hbm [shape: f32[8,256], index: 4, kind: output, shape index: {}]  }
   0x1   :  { %13 = vsyncpa [#allocation7], 0  ;;  %s25_s17 = sshll.u32 %s207_s3, 4  ;;  %s162_s18 = smov [#allocation5]   ;;  %s26_s17 = int_to_ptr.hbm [resolvable:$true] %s25_s17 }
   0x2   :  { %s27_s19 = sshll.u32 %s162_s18, 4  ;;  %s28_s19 = int_to_ptr.vmem [resolvable:$true] %s27_s19 }
   0x3   :  { %30 = dma.hbm_to_vmem [thread:$0]  %s26_s17, 256, %s28_s19, [#allocation6]  }
   0x4   :  { %158 = dma.done.wait [#allocation6], 256  }
   0x5   :  { %159 = vsyncadd [#allocation6], 4294967040  ;;  %v36_v0 = vlaneseq  ;;  %s47_s22 = smul.u32 2654435769, %s204_s0  ;;  %v70_v24 = vstv %s205_s1  ;;  %v77_v26 = vld [vmem:[#allocation5] sm:$0xff]  ;;  %v80_v27 = vstv %s206_s2  ;;  %v78_v29 = vld [vmem:[#allocation5 + $0x8] sm:$0xff] }
   0x6   :  { %v105_v31 = vxor.u32 2147483648, %v70_v24  ;;  %v81_v33 = vmul.f32 %v80_v27, %v77_v26  ;;  %v82_v34 = vmul.f32 %v80_v27, %v78_v29  ;;  %s163_s25 = smov [#allocation8]   ;;  %s94_s1 = sshll.u32 %s208_s4, 4  ;;  %s95_s1 = int_to_ptr.hbm [resolvable:$true] %s94_s1 }
   0x7   :  { %v37_v1 = vshrl.u32 %v36_v0, 7  ;;  %v41_v2 = vand.u32 127, %v36_v0  ;;  %v48_v5 = vstv %s47_s22  ;;  %s92_s26 = sshll.u32 %s163_s25, 4  ;;  %s93_s26 = int_to_ptr.vmem [resolvable:$true] %s92_s26 }
   0x9   :  { %v43_v3 = vmul.u32 256, %v37_v1  ;;  %v42_v4 = vadd.s32 128, %v41_v2 }
   0xb   :  { %v44_v6 = vadd.s32 %v43_v3, %v41_v2  ;;  %v45_v7 = vadd.s32 %v43_v3, %v42_v4 }
   0xd   :  { %v49_v8 = vadd.s32 %v48_v5, %v44_v6  ;;  %v50_v9 = vadd.s32 %v48_v5, %v45_v7 }
   0xf   :  { %v51_v10 = vshrl.u32 %v49_v8, 16  ;;  %v52_v11 = vshrl.u32 %v50_v9, 16 }
  0x11   :  { %v53_v12 = vxor.u32 %v51_v10, %v49_v8  ;;  %v54_v13 = vxor.u32 %v52_v11, %v50_v9 }
  0x13   :  { %v55_v14 = vmul.u32 2146121005, %v53_v12  ;;  %v56_v15 = vmul.u32 2146121005, %v54_v13 }
  0x15   :  { %v57_v16 = vshrl.u32 %v55_v14, 15  ;;  %v58_v17 = vshrl.u32 %v56_v15, 15 }
  0x17   :  { %v59_v18 = vxor.u32 %v57_v16, %v55_v14  ;;  %v60_v19 = vxor.u32 %v58_v17, %v56_v15 }
  0x19   :  { %v61_v20 = vmul.u32 2221713035, %v59_v18  ;;  %v62_v21 = vmul.u32 2221713035, %v60_v19 }
  0x1b   :  { %v63_v22 = vshrl.u32 %v61_v20, 16  ;;  %v64_v23 = vshrl.u32 %v62_v21, 16 }
  0x1d   :  { %v65_v25 = vxor.u32 %v63_v22, %v61_v20  ;;  %v66_v28 = vxor.u32 %v64_v23, %v62_v21 }
  0x1f   :  { %v67_v30 = vshrl.u32 %v65_v25, 8  ;;  %v68_v32 = vshrl.u32 %v66_v28, 8 }
  0x21   :  { %v104_v35 = vxor.u32 2147483648, %v67_v30  ;;  %v106_v36 = vxor.u32 2147483648, %v68_v32 }
  0x23   :  { %vm73_vm0 = vcmp.gt.s32.totalorder %v104_v35, %v105_v31  ;;  %vm76_vm1 = vcmp.gt.s32.totalorder %v106_v36, %v105_v31 }
  0x24   :  { %v83_v37 = vsel %vm73_vm0, %v81_v33, 0.0  ;;  %v84_v38 = vsel %vm76_vm1, %v82_v34, 0.0 }
  0x25   :  { %85 = vst [vmem:[#allocation8] sm:$0xff] %v83_v37 }
  0x26   :  { %86 = vst [vmem:[#allocation8 + $0x8] sm:$0xff] %v84_v38 }
  0x27   :  { %97 = dma.vmem_to_hbm [thread:$0]  %s93_s26, 256, %s95_s1, [#allocation7]  }
  0x28   :  { %160 = dma.done.wait [#allocation7], 256  }
  0x29   :  { %161 = vsyncadd [#allocation7], 4294967040 }
  0x2a   :  { %102 = vsyncpa [#allocation6], 1 }
  0x2b   :  { %103 = vsyncpa [#allocation7], 1 }

</bundles_post_ra>
